<compile_context>
chip_gen: v5e
topology: v5e:2x2
jax: 0.10.0
libtpu: 0.0.40
codegen_flags: <defaults>
</compile_context>

<pallas_src>
import jax
import jax.numpy as jnp
from jax.experimental import pallas as pl
from jax.experimental.pallas import tpu as pltpu


def _round_up(x, m):
    return ((x + m - 1) // m) * m


# ----------------------------------------------------------------------------
# Parameter packing (done once, outside the hot path)
# ----------------------------------------------------------------------------
def pack_params(params, field_size, num_enemies):
    """Pack all weights into one slab and all biases into one slab.

    Weight slab layout (row offsets sublane-aligned, LW = max(96+32E, 128) lanes):
        rows [r_in  : +Kin_pad)  block-diagonal input weight (1/fs folded in)
        rows [r_agg : +32     )  aggregation_fc            (32 x 32)
        rows [r_f1m : +FW     )  fc1 main part (rows 0:96 of fc1, rest zero)
        rows [r_f1a : +32     )  fc1 agg part  (rows 96:128 of fc1)
        rows [r_fc2 : +64     )  fc2                       (64 x 32)
        rows [r_fc3 : +32     )  fc3 padded to an 8-lane output
    Bias slab: one row per layer, lane-padded to LW, sublane-padded to 8 rows.
    """
    E = int(num_enemies)
    assert E >= 1, "need at least one enemy"
    Kin = 2 * (3 + E)
    Kin_pad = _round_up(Kin, 8)
    FW = 96 + 32 * E                      # block-diagonal feature width
    LW = max(FW, 128)                     # slab lane width

    inv_fs = (1.0 / jnp.asarray(field_size, jnp.float32)).reshape(2, 1)

    # Block-diagonal input-layer weight with 1/field_size folded into its rows:
    #   (x / fs) @ W  ==  x @ (diag(1/fs) @ W)
    w_in = jnp.zeros((Kin_pad, FW), jnp.float32)
    branch_ws = [params["w_pos"], params["w_vel"], params["w_goal"]] + [params["w_en"]] * E
    for k, w in enumerate(branch_ws):
        w_in = w_in.at[2 * k:2 * k + 2, 32 * k:32 * k + 32].set(w * inv_fs)
    b_in = jnp.concatenate(
        [params["b_pos"], params["b_vel"], params["b_goal"]] + [params["b_en"]] * E,
        axis=-1)                                                   # (1, FW)

    # fc1 split: main part applied to the full FW-wide feature slab (enemy
    # rows zeroed -> exact), agg part applied to the aggregated enemy feature.
    w_fc1_main = jnp.zeros((FW, 64), jnp.float32).at[0:96, :].set(params["w_fc1"][0:96, :])
    w_fc1_agg = params["w_fc1"][96:128, :]                         # (32, 64)

    # fc3 padded to an 8-lane output (cols 2:8 are exactly zero).
    w3 = jnp.zeros((32, 8), jnp.float32).at[:, :2].set(params["w_fc3"])
    b3 = jnp.zeros((1, 8), jnp.float32).at[:, :2].set(params["b_fc3"])

    blocks = [w_in, params["w_agg"], w_fc1_main, w_fc1_agg, params["w_fc2"], w3]
    row_off, rows, r = [], [], 0
    for w in blocks:
        row_off.append(r)
        rpad = _round_up(w.shape[0], 8)
        rows.append(jnp.pad(w, ((0, rpad - w.shape[0]), (0, LW - w.shape[1]))))
        r += rpad
    w_slab = jnp.concatenate(rows, axis=0)                         # (368, 192) for E=3

    biases = [b_in, params["b_agg"], params["b_fc1"], params["b_fc2"], b3]
    b_slab = jnp.concatenate(
        [jnp.pad(b, ((0, 0), (0, LW - b.shape[1]))) for b in biases], axis=0)
    b_slab = jnp.pad(b_slab, ((0, 8 - b_slab.shape[0]), (0, 0)))   # (8, LW)

    meta = dict(E=E, Kin=Kin, Kin_pad=Kin_pad, FW=FW, LW=LW, row_off=tuple(row_off))
    return w_slab, b_slab, meta


# ----------------------------------------------------------------------------
# Kernel
# ----------------------------------------------------------------------------
def _make_kernel(E, Kin_pad, FW, row_off):
    r_in, r_agg, r_f1m, r_f1a, r_fc2, r_fc3 = row_off

    def kernel(x_ref, w_ref, b_ref, out_ref):
        f32 = jnp.float32
        relu = jax.nn.relu

        # One block-diagonal matmul computes all (3 + E) input branches at once.
        # 1/field_size was folded into the weight rows at pack time.
        feat = relu(
            jnp.dot(x_ref[...], w_ref[r_in:r_in + Kin_pad, 0:FW],
                    preferred_element_type=f32)
            + b_ref[0:1, 0:FW])                                    # (bb, 96+32E)

        # Enemy aggregation: sum the E lane-contiguous 32-wide feature chunks.
        agg = feat[:, 96:128]
        for e in range(1, E):                                      # static, tiny E
            agg = agg + feat[:, 96 + 32 * e:128 + 32 * e]
        agg_f = relu(
            jnp.dot(agg, w_ref[r_agg:r_agg + 32, 0:32],
                    preferred_element_type=f32)
            + b_ref[1:2, 0:32])                                    # (bb, 32)

        # fc1 as two accumulating MXU pushes: K=FW over the full feature slab
        # (enemy rows of the packed weight are zero -> exact) plus K=32 over
        # the aggregated enemy feature.  No concat, no sub-tile lane slice.
        h1 = relu(
            jnp.dot(feat, w_ref[r_f1m:r_f1m + FW, 0:64],
                    preferred_element_type=f32)
            + jnp.dot(agg_f, w_ref[r_f1a:r_f1a + 32, 0:64],
                      preferred_element_type=f32)
            + b_ref[2:3, 0:64])                                    # (bb, 64)

        h2 = relu(
            jnp.dot(h1, w_ref[r_fc2:r_fc2 + 64, 0:32],
                    preferred_element_type=f32)
            + b_ref[3:4, 0:32])                                    # (bb, 32)

        # fc3 padded to 8 output lanes -> compact HBM writeback (32 B/row).
        out_ref[...] = (
            jnp.dot(h2, w_ref[r_fc3:r_fc3 + 32, 0:8],
                    preferred_element_type=f32)
            + b_ref[4:5, 0:8])                                     # (bb, 8)

    return kernel


# ----------------------------------------------------------------------------
# Wrapper
# ----------------------------------------------------------------------------
def soccer_observer_forward(packed, robot_position, robot_velocity,
                            goal_position, enemies_positions, *, block_b=1024):
    """packed = pack_params(...). Returns the (B, 2) action."""
    w_slab, b_slab, meta = packed
    E, Kin, Kin_pad, FW = meta["E"], meta["Kin"], meta["Kin_pad"], meta["FW"]
    assert enemies_positions.shape[0] == E

    B = robot_position.shape[0]

    # Pack activations into one slab: rp | rv | gp | en_0 | ... | en_{E-1}.
    en = jnp.moveaxis(enemies_positions.astype(jnp.float32), 0, 1).reshape(B, 2 * E)
    x = jnp.concatenate([robot_position.astype(jnp.float32),
                         robot_velocity.astype(jnp.float32),
                         goal_position.astype(jnp.float32), en], axis=-1)  # (B, Kin)
    x = jnp.pad(x, ((0, 0), (0, Kin_pad - Kin)))

    # Batch tiling: single "parallel" grid axis; weights stay resident (constant
    # index_map). Tile <= 1024 rows keeps double-buffered tiles far below the
    # scoped-VMEM default on v5e/v6e/v7x.
    bb = min(block_b, _round_up(B, 8))
    Bp = _round_up(B, bb)
    if Bp != B:
        x = jnp.pad(x, ((0, Bp - B), (0, 0)))

    kernel = _make_kernel(E, Kin_pad, FW, meta["row_off"])
    out = pl.pallas_call(
        kernel,
        out_shape=jax.ShapeDtypeStruct((Bp, 8), jnp.float32),
        grid=(Bp // bb,),
        in_specs=[
            pl.BlockSpec((bb, Kin_pad), lambda i: (i, 0)),   # activation slab
            pl.BlockSpec(w_slab.shape, lambda i: (0, 0)),    # resident weight slab
            pl.BlockSpec(b_slab.shape, lambda i: (0, 0)),    # resident bias slab
        ],
        out_specs=pl.BlockSpec((bb, 8), lambda i: (i, 0)),
        compiler_params=pltpu.CompilerParams(
            dimension_semantics=("parallel",)),
    )(x, w_slab, b_slab)

    return out[:B, :2]


# ----------------------------------------------------------------------------
# Synthetic parameters & pure-JAX reference
# ----------------------------------------------------------------------------
def init_params(key):
    def linear(key, fan_in, fan_out):
        kw, kb = jax.random.split(key)
        scale = 1.0 / jnp.sqrt(fan_in)
        w = jax.random.uniform(kw, (fan_in, fan_out), jnp.float32, -scale, scale)
        b = jax.random.uniform(kb, (1, fan_out), jnp.float32, -scale, scale)
        return w, b

    keys = jax.random.split(key, 8)
    p = {}
    p["w_pos"],  p["b_pos"]  = linear(keys[0], 2, 32)
    p["w_vel"],  p["b_vel"]  = linear(keys[1], 2, 32)
    p["w_goal"], p["b_goal"] = linear(keys[2], 2, 32)
    p["w_en"],   p["b_en"]   = linear(keys[3], 2, 32)
    p["w_agg"],  p["b_agg"]  = linear(keys[4], 32, 32)
    p["w_fc1"],  p["b_fc1"]  = linear(keys[5], 4 * 32, 64)
    p["w_fc2"],  p["b_fc2"]  = linear(keys[6], 64, 32)
    p["w_fc3"],  p["b_fc3"]  = linear(keys[7], 32, 2)
    return p


def reference_forward(params, field_size, rp, rv, gp, enemies):
    """Pure-JAX reference replicating the PyTorch forward."""
    fs = field_size.reshape(1, 2)
    relu = jax.nn.relu
    lin = lambda x, w, b: x @ w + b
    pos_f = relu(lin(rp / fs, params["w_pos"], params["b_pos"]))
    vel_f = relu(lin(rv / fs, params["w_vel"], params["b_vel"]))
    goal_f = relu(lin(gp / fs, params["w_goal"], params["b_goal"]))
    agg = sum(relu(lin(enemies[e] / fs, params["w_en"], params["b_en"]))
              for e in range(enemies.shape[0]))
    agg_f = relu(lin(agg, params["w_agg"], params["b_agg"]))
    combined = jnp.concatenate([pos_f, vel_f, goal_f, agg_f], axis=-1)
    x = relu(lin(combined, params["w_fc1"], params["b_fc1"]))
    x = relu(lin(x, params["w_fc2"], params["b_fc2"]))
    return lin(x, params["w_fc3"], params["b_fc3"])


if __name__ == "__main__":
    key = jax.random.PRNGKey(0)
    kp, kd = jax.random.split(key)
    params = init_params(kp)

    B, E = 8, 3
    field_size = jnp.array([9.0, 6.0], jnp.float32)
    k1, k2, k3, k4 = jax.random.split(kd, 4)
    robot_position = jax.random.uniform(k1, (B, 2), jnp.float32, -4.5, 4.5)
    robot_velocity = jax.random.uniform(k2, (B, 2), jnp.float32, -1.0, 1.0)
    goal_position = jax.random.uniform(k3, (B, 2), jnp.float32, -4.5, 4.5)
    enemies_positions = jax.random.uniform(k4, (E, B, 2), jnp.float32, -4.5, 4.5)

    packed = pack_params(params, field_size, E)

    out = soccer_observer_forward(packed, robot_position, robot_velocity,
                                  goal_position, enemies_positions)
    out = jax.block_until_ready(out)

    ref = reference_forward(params, field_size, robot_position,
                            robot_velocity, goal_position, enemies_positions)
    assert out.shape == (B, 2)
    # Slightly looser than 1e-5: folding 1/field_size into the block-diagonal
    # weight and the split fc1 accumulation reorder a few f32 ops (~1e-6).
    assert jnp.allclose(out, ref, atol=1e-4, rtol=1e-4), "mismatch vs reference"

    print("KERNEL_OK")
</pallas_src>

<mosaic_0001>
module attributes {stable_mosaic.version = 11 : i64} {
  func.func @kernel(%arg0: i32, %arg1: memref<8x16xf32, #tpu.memory_space<vmem>>, %arg2: memref<368x192xf32, #tpu.memory_space<vmem>>, %arg3: memref<8x192xf32, #tpu.memory_space<vmem>>, %arg4: memref<8x8xf32, #tpu.memory_space<vmem>>) attributes {dimension_semantics = [#tpu.dimension_semantics<parallel>], iteration_bounds = array<i64: 1>, scalar_prefetch = 0 : i64, scratch_operands = 0 : i64, tpu.core_type = #tpu.core_type<tc>, window_params = [{transform_indices = @transform_0, window_bounds = array<i64: 8, 16>}, {pipeline_mode = #tpu.pipeline_mode<synchronous>, transform_indices = @transform_1, window_bounds = array<i64: 368, 192>}, {pipeline_mode = #tpu.pipeline_mode<synchronous>, transform_indices = @transform_2, window_bounds = array<i64: 8, 192>}, {transform_indices = @transform_3, window_bounds = array<i64: 8, 8>}]} {
    %c0 = arith.constant 0 : index
    %c0_0 = arith.constant 0 : index
    %0 = vector.load %arg1[%c0, %c0_0] : memref<8x16xf32, #tpu.memory_space<vmem>>, vector<8x16xf32>
    %c0_1 = arith.constant 0 : index
    %c0_2 = arith.constant 0 : index
    %1 = vector.load %arg2[%c0_1, %c0_2] : memref<368x192xf32, #tpu.memory_space<vmem>>, vector<16x192xf32>
    %cst = arith.constant dense<0.000000e+00> : vector<8x192xf32>
    %2 = tpu.matmul %0, %1, %cst {dimension_numbers = #tpu.dot_dimension_numbers<[1], [0], [0], [1], [0, 0, 1, 1], [], []>} : vector<8x16xf32>, vector<16x192xf32>, vector<8x192xf32> -> vector<8x192xf32>
    %c0_3 = arith.constant 0 : index
    %c0_4 = arith.constant 0 : index
    %3 = vector.load %arg3[%c0_3, %c0_4] : memref<8x192xf32, #tpu.memory_space<vmem>>, vector<1x192xf32>
    %4 = vector.broadcast %3 : vector<1x192xf32> to vector<8x192xf32>
    %5 = arith.addf %2, %4 : vector<8x192xf32>
    %cst_5 = arith.constant 0.000000e+00 : f32
    %6 = vector.broadcast %cst_5 : f32 to vector<8x192xf32>
    %7 = arith.maximumf %5, %6 : vector<8x192xf32>
    %8 = vector.extract_strided_slice %7 {offsets = [0, 96], sizes = [8, 32], strides = [1, 1]} : vector<8x192xf32> to vector<8x32xf32>
    %9 = vector.extract_strided_slice %7 {offsets = [0, 128], sizes = [8, 32], strides = [1, 1]} : vector<8x192xf32> to vector<8x32xf32>
    %10 = arith.addf %8, %9 : vector<8x32xf32>
    %11 = vector.extract_strided_slice %7 {offsets = [0, 160], sizes = [8, 32], strides = [1, 1]} : vector<8x192xf32> to vector<8x32xf32>
    %12 = arith.addf %10, %11 : vector<8x32xf32>
    %c16 = arith.constant 16 : index
    %c0_6 = arith.constant 0 : index
    %13 = vector.load %arg2[%c16, %c0_6] : memref<368x192xf32, #tpu.memory_space<vmem>>, vector<32x32xf32>
    %cst_7 = arith.constant dense<0.000000e+00> : vector<8x32xf32>
    %14 = tpu.matmul %12, %13, %cst_7 {dimension_numbers = #tpu.dot_dimension_numbers<[1], [0], [0], [1], [0, 0, 1, 1], [], []>} : vector<8x32xf32>, vector<32x32xf32>, vector<8x32xf32> -> vector<8x32xf32>
    %c1 = arith.constant 1 : index
    %c0_8 = arith.constant 0 : index
    %15 = vector.load %arg3[%c1, %c0_8] : memref<8x192xf32, #tpu.memory_space<vmem>>, vector<1x32xf32>
    %16 = vector.broadcast %15 : vector<1x32xf32> to vector<8x32xf32>
    %17 = arith.addf %14, %16 : vector<8x32xf32>
    %cst_9 = arith.constant 0.000000e+00 : f32
    %18 = vector.broadcast %cst_9 : f32 to vector<8x32xf32>
    %19 = arith.maximumf %17, %18 : vector<8x32xf32>
    %c48 = arith.constant 48 : index
    %c0_10 = arith.constant 0 : index
    %20 = vector.load %arg2[%c48, %c0_10] : memref<368x192xf32, #tpu.memory_space<vmem>>, vector<192x64xf32>
    %cst_11 = arith.constant dense<0.000000e+00> : vector<8x64xf32>
    %21 = tpu.matmul %7, %20, %cst_11 {dimension_numbers = #tpu.dot_dimension_numbers<[1], [0], [0], [1], [0, 0, 1, 1], [], []>} : vector<8x192xf32>, vector<192x64xf32>, vector<8x64xf32> -> vector<8x64xf32>
    %c240 = arith.constant 240 : index
    %c0_12 = arith.constant 0 : index
    %22 = vector.load %arg2[%c240, %c0_12] : memref<368x192xf32, #tpu.memory_space<vmem>>, vector<32x64xf32>
    %cst_13 = arith.constant dense<0.000000e+00> : vector<8x64xf32>
    %23 = tpu.matmul %19, %22, %cst_13 {dimension_numbers = #tpu.dot_dimension_numbers<[1], [0], [0], [1], [0, 0, 1, 1], [], []>} : vector<8x32xf32>, vector<32x64xf32>, vector<8x64xf32> -> vector<8x64xf32>
    %24 = arith.addf %21, %23 : vector<8x64xf32>
    %c2 = arith.constant 2 : index
    %c0_14 = arith.constant 0 : index
    %25 = vector.load %arg3[%c2, %c0_14] : memref<8x192xf32, #tpu.memory_space<vmem>>, vector<1x64xf32>
    %26 = vector.broadcast %25 : vector<1x64xf32> to vector<8x64xf32>
    %27 = arith.addf %24, %26 : vector<8x64xf32>
    %cst_15 = arith.constant 0.000000e+00 : f32
    %28 = vector.broadcast %cst_15 : f32 to vector<8x64xf32>
    %29 = arith.maximumf %27, %28 : vector<8x64xf32>
    %c272 = arith.constant 272 : index
    %c0_16 = arith.constant 0 : index
    %30 = vector.load %arg2[%c272, %c0_16] : memref<368x192xf32, #tpu.memory_space<vmem>>, vector<64x32xf32>
    %cst_17 = arith.constant dense<0.000000e+00> : vector<8x32xf32>
    %31 = tpu.matmul %29, %30, %cst_17 {dimension_numbers = #tpu.dot_dimension_numbers<[1], [0], [0], [1], [0, 0, 1, 1], [], []>} : vector<8x64xf32>, vector<64x32xf32>, vector<8x32xf32> -> vector<8x32xf32>
    %c3 = arith.constant 3 : index
    %c0_18 = arith.constant 0 : index
    %32 = vector.load %arg3[%c3, %c0_18] : memref<8x192xf32, #tpu.memory_space<vmem>>, vector<1x32xf32>
    %33 = vector.broadcast %32 : vector<1x32xf32> to vector<8x32xf32>
    %34 = arith.addf %31, %33 : vector<8x32xf32>
    %cst_19 = arith.constant 0.000000e+00 : f32
    %35 = vector.broadcast %cst_19 : f32 to vector<8x32xf32>
    %36 = arith.maximumf %34, %35 : vector<8x32xf32>
    %c336 = arith.constant 336 : index
    %c0_20 = arith.constant 0 : index
    %37 = vector.load %arg2[%c336, %c0_20] : memref<368x192xf32, #tpu.memory_space<vmem>>, vector<32x8xf32>
    %cst_21 = arith.constant dense<0.000000e+00> : vector<8x8xf32>
    %38 = tpu.matmul %36, %37, %cst_21 {dimension_numbers = #tpu.dot_dimension_numbers<[1], [0], [0], [1], [0, 0, 1, 1], [], []>} : vector<8x32xf32>, vector<32x8xf32>, vector<8x8xf32> -> vector<8x8xf32>
    %c4 = arith.constant 4 : index
    %c0_22 = arith.constant 0 : index
    %39 = vector.load %arg3[%c4, %c0_22] : memref<8x192xf32, #tpu.memory_space<vmem>>, vector<1x8xf32>
    %40 = vector.broadcast %39 : vector<1x8xf32> to vector<8x8xf32>
    %41 = arith.addf %38, %40 : vector<8x8xf32>
    %c0_23 = arith.constant 0 : index
    %c0_24 = arith.constant 0 : index
    %42 = vector.load %arg4[%c0_23, %c0_24] : memref<8x8xf32, #tpu.memory_space<vmem>>, vector<8x8xf32>
    tpu.vector_store %arg4[%c0_23, %c0_24], %41 {strides = array<i32>} : memref<8x8xf32, #tpu.memory_space<vmem>>, vector<8x8xf32>,
    return
  }
  func.func @transform_0(%arg0: i32) -> (i32, i32) {
    %c0_i32 = arith.constant 0 : i32
    %c0_i32_0 = arith.constant 0 : i32
    return %arg0, %c0_i32 : i32, i32
  }
  func.func @transform_1(%arg0: i32) -> (i32, i32) {
    %c0_i32 = arith.constant 0 : i32
    %c0_i32_0 = arith.constant 0 : i32
    %c0_i32_1 = arith.constant 0 : i32
    return %c0_i32, %c0_i32_0 : i32, i32
  }
  func.func @transform_2(%arg0: i32) -> (i32, i32) {
    %c0_i32 = arith.constant 0 : i32
    %c0_i32_0 = arith.constant 0 : i32
    %c0_i32_1 = arith.constant 0 : i32
    return %c0_i32, %c0_i32_0 : i32, i32
  }
  func.func @transform_3(%arg0: i32) -> (i32, i32) {
    %c0_i32 = arith.constant 0 : i32
    %c0_i32_0 = arith.constant 0 : i32
    return %arg0, %c0_i32 : i32, i32
  }
}

</mosaic_0001>

<bundles_post_ra>
// kernel: tpu_custom_call.1
= control target key start
LH: loop header
LB: loop body
LE: loop exit
PB: predicated region body
PF: predicated region fallthrough
CT: control target
= control target key end

     0   :  { %vm26_vm0 = vcmask 130048   ;;  %s520_s0 = inlined_call_operand.vmem [shape: f32[8,16], index: 0, kind: input, shape index: {}]   ;;  %s521_s1 = inlined_call_operand.vmem [shape: f32[368,192], index: 1, kind: input, shape index: {}]   ;;  %s522_s2 = inlined_call_operand.vmem [shape: f32[8,192], index: 2, kind: input, shape index: {}]   ;;  %s523_s3 = inlined_call_operand.hbm [shape: f32[8,8], index: 3, kind: output, shape index: {}]  }
   0x1   :  { %v19_v0 = vld [vmem:[%s521_s1 + $0x18] sm:$0xff]  ;;  %v17_v1 = vld [vmem:[%s521_s1 + $0x8] sm:$0xff]  ;;  %v15_v2 = vld [vmem:[%s520_s0] sm:$0xff] }
   0x2   :  { %64 = vmatpush.msra.mxu1 %v19_v0  ;;  %v18_v3 = vld [vmem:[%s521_s1 + $0x10] sm:$0xff]  ;;  %v16_v4 = vld [vmem:[%s521_s1] sm:$0xff] }
   0x3   :  { %44 = vmatpush.msra.mxu3 %v18_v3  ;;  %v136_v5 = vld [vmem:[%s521_s1 + $0x1d0] sm:$0xff] }
   0x4   :  { %65 = vmatpush.msra.mxu1 %v17_v1 }
   0x5   :  { %8 = vsyncpa [#allocation3], 0  ;;  %290 = vmatmul.msk.f32.vlgmr.msra.gmra.mxu1 %vm26_vm0, %v15_v2  ;;  %45 = vmatpush.msra.mxu3 %v16_v4  ;;  %v135_v6 = vld [vmem:[%s521_s1 + $0x1c0] sm:$0xff]  ;;  %v134_v7 = vld [vmem:[%s521_s1 + $0x1b0] sm:$0xff]  ;;  %vm164_vm1 = vcmask 523264   ;;  %s326_s10 = smov 96  }
   0x6   :  { %289 = vmatmul.msk.f32.vlgmr.msra.gmra.mxu3 %vm26_vm0, %v15_v2  ;;  %195 = vmatpush.msrb.mxu1 %v136_v5  ;;  %v133_v8 = vld [vmem:[%s521_s1 + $0x1a0] sm:$0xff]  ;;  %v132_v9 = vld [vmem:[%s521_s1 + $0x190] sm:$0xff]  ;;  %s327_s11 = smov 64   ;;  %s328_s25 = smov 32   ;;  %vm89_vm2 = vcmask 261120   ;;  %vm271_vm3 = vcmask 64512  }
   0x7   :  { %v131_v10 = vld [vmem:[%s521_s1 + $0x180] sm:$0xff]  ;;  %v130_v11 = vld [vmem:[%s521_s1 + $0x170] sm:$0xff] }
   0x8   :  { %196 = vmatpush.msrb.mxu1 %v135_v6  ;;  %v129_v12 = vld [vmem:[%s521_s1 + $0x160] sm:$0xff]  ;;  %v128_v13 = vld [vmem:[%s521_s1 + $0x150] sm:$0xff] }
   0x9   :  { %v127_v14 = vld [vmem:[%s521_s1 + $0x140] sm:$0xff]  ;;  %167 = vmatpush.msra.mxu0 %v128_v13  ;;  %v126_v15 = vld [vmem:[%s521_s1 + $0x130] sm:$0xff] }
   0xa   :  { %197 = vmatpush.msrb.mxu1 %v134_v7  ;;  %v125_v16 = vld [vmem:[%s521_s1 + $0x120] sm:$0xff]  ;;  %v124_v17 = vld [vmem:[%s521_s1 + $0x110] sm:$0xff] }
   0xb   :  { %168 = vmatpush.msra.mxu0 %v127_v14  ;;  %v123_v18 = vld [vmem:[%s521_s1 + $0x100] sm:$0xff]  ;;  %v122_v19 = vld [vmem:[%s521_s1 + $0xf0] sm:$0xff] }
   0xc   :  { %198 = vmatpush.msrb.mxu1 %v133_v8  ;;  %v121_v20 = vld [vmem:[%s521_s1 + $0xe0] sm:$0xff]  ;;  %v120_v22 = vld [vmem:[%s521_s1 + $0xd0] sm:$0xff] }
   0xd   :  { %169 = vmatpush.msra.mxu0 %v126_v15  ;;  %v20_v21 = vld [vmem:[%s522_s2] ss:$8 sm:$0x3]  ;;  %v118_v25 = vld [vmem:[%s521_s1 + $0xb0] sm:$0xff]  ;;  %v85_v54 = vld [vmem:[%s522_s2 + $0x1] ss:$0 sm:$0xff] }
   0xe   :  { %199 = vmatpush.msrb.mxu1 %v132_v9  ;;  %v23_v23 = vperm.slane %v20_v21, 1  ;;  %v119_v24 = vld [vmem:[%s521_s1 + $0xc0] sm:$0xff]  ;;  %v116_v30 = vld [vmem:[%s521_s1 + $0x90] sm:$0xff]  ;;  %v22_v31 = vperm.slane %v20_v21, 0 }
   0xf   :  { %170 = vmatpush.msra.mxu0 %v125_v16  ;;  %v117_v28 = vld [vmem:[%s521_s1 + $0xa0] sm:$0xff]  ;;  %v114_v35 = vld [vmem:[%s521_s1 + $0x70] sm:$0xff] }
  0x10   :  { %200 = vmatpush.msrb.mxu1 %v131_v10  ;;  %v115_v34 = vld [vmem:[%s521_s1 + $0x80] sm:$0xff]  ;;  %v84_v38 = vld [vmem:[%s521_s1 + $0x50] sm:$0xff] }
  0x11   :  { %171 = vmatpush.msra.mxu0 %v124_v17  ;;  %v113_v36 = vld [vmem:[%s521_s1 + $0x60] sm:$0xff]  ;;  %104 = vmatpush.msra.mxu2 %v84_v38  ;;  %v82_v40 = vld [vmem:[%s521_s1 + $0x30] sm:$0xff] }
  0x12   :  { %201 = vmatpush.msrb.mxu1 %v130_v11  ;;  %v83_v39 = vld [vmem:[%s521_s1 + $0x40] sm:$0xff]  ;;  %v140_v46 = vld [vmem:[%s521_s1 + $0x210] sm:$0xff] }
  0x13   :  { %172 = vmatpush.msra.mxu0 %v123_v18  ;;  %105 = vmatpush.msra.mxu2 %v83_v39  ;;  %v81_v41 = vld [vmem:[%s521_s1 + $0x20] sm:$0xff]  ;;  %v138_v49 = vld [vmem:[%s521_s1 + $0x1f0] sm:$0xff] }
  0x14   :  { %202 = vmatpush.msrb.mxu1 %v129_v12  ;;  %v139_v47 = vld [vmem:[%s521_s1 + $0x200] sm:$0xff]  ;;  %156 = vmatpush.msrb.mxu3 %v140_v46  ;;  %v217_v51 = vld [vmem:[%s521_s1 + $0x290] sm:$0xff] }
  0x15   :  { %173 = vmatpush.msra.mxu0 %v122_v19  ;;  %106 = vmatpush.msra.mxu2 %v82_v40  ;;  %v137_v50 = vld [vmem:[%s521_s1 + $0x1e0] sm:$0xff]  ;;  %v215_v53 = vld [vmem:[%s521_s1 + $0x270] sm:$0xff] }
  0x16   :  { %157 = vmatpush.msrb.mxu3 %v139_v47  ;;  %v216_v52 = vld [vmem:[%s521_s1 + $0x280] sm:$0xff]  ;;  %v213_v59 = vld [vmem:[%s521_s1 + $0x250] sm:$0xff] }
  0x17   :  { %174 = vmatpush.msra.mxu0 %v121_v20  ;;  %107 = vmatpush.msra.mxu2 %v81_v41  ;;  %v214_v58 = vld [vmem:[%s521_s1 + $0x260] sm:$0xff]  ;;  %v211_v61 = vld [vmem:[%s521_s1 + $0x230] sm:$0xff] }
  0x18   :  { %158 = vmatpush.msrb.mxu3 %v138_v49  ;;  %v212_v60 = vld [vmem:[%s521_s1 + $0x240] sm:$0xff]  ;;  %v246_v63 = vld [vmem:[%s521_s1 + $0x2d0] sm:$0xff] }
  0x19   :  { %175 = vmatpush.msra.mxu0 %v120_v22  ;;  %230 = vmatpush.msrb.mxu2 %v217_v51  ;;  %v210_v62 = vld [vmem:[%s521_s1 + $0x220] sm:$0xff]  ;;  %v244_v9 = vld [vmem:[%s521_s1 + $0x2b0] sm:$0xff] }
  0x1a   :  { %159 = vmatpush.msrb.mxu3 %v137_v50  ;;  %v245_v0 = vld [vmem:[%s521_s1 + $0x2c0] sm:$0xff] }
  0x1b   :  { %176 = vmatpush.msra.mxu0 %v119_v24  ;;  %231 = vmatpush.msrb.mxu2 %v216_v52  ;;  %v207_v5 = vld [vmem:[%s522_s2 + $0x2] ss:$0 sm:$0xff]  ;;  %v218_v11 = vld [vmem:[%s522_s2 + $0x3] ss:$0 sm:$0xff]  ;;  %v247_v15 = vld [vmem:[%s522_s2 + $0x4] ss:$0 sm:$0xff] }
  0x1c   :  { %263 = vmatpush.msra.mxu3 %v246_v63  ;;  %v243_v10 = vld [vmem:[%s521_s1 + $0x2a0] sm:$0xff]  ;;  %s280_s1 = sshll.u32 %s523_s3, 4  ;;  %s281_s1 = int_to_ptr.hbm [resolvable:$true] %s280_s1 }
  0x1d   :  { %177 = vmatpush.msra.mxu0 %v118_v25  ;;  %232 = vmatpush.msrb.mxu2 %v215_v53 }
  0x1e   :  { %264 = vmatpush.msra.mxu3 %v245_v0 }
  0x1f   :  { %178 = vmatpush.msra.mxu0 %v117_v28  ;;  %233 = vmatpush.msrb.mxu2 %v214_v58 }
  0x20   :  { %265 = vmatpush.msra.mxu3 %v244_v9 }
  0x21   :  { %179 = vmatpush.msra.mxu0 %v116_v30  ;;  %234 = vmatpush.msrb.mxu2 %v213_v59 }
  0x22   :  { %266 = vmatpush.msra.mxu3 %v243_v10 }
  0x23   :  { %180 = vmatpush.msra.mxu0 %v115_v34  ;;  %235 = vmatpush.msrb.mxu2 %v212_v60 }
  0x25   :  { %181 = vmatpush.msra.mxu0 %v114_v35  ;;  %236 = vmatpush.msrb.mxu2 %v211_v61 }
  0x27   :  { %182 = vmatpush.msra.mxu0 %v113_v36  ;;  %237 = vmatpush.msrb.mxu2 %v210_v62 }
  0x82   :  { %v67_v26 = vpop.f32.mrf.mxu1 }
  0x83   :  { %v68_v27 = vadd.f32 %v67_v26, %v23_v23 }
  0x85   :  { %v71_v29 = vmax.f32 %v68_v27, 0.0 }
  0x87   :  { %73 = vrot.lane.b32.xlu0 %v71_v29, %s326_s10  ;;  %293 = vmatmul.msk.f32.vlgmr.msrb.gmra.mxu1 %vm164_vm1, %v71_v29 }
  0x89   :  { %v47_v32 = vpop.f32.mrf.mxu3 }
  0x8a   :  { %v48_v33 = vadd.f32 %v47_v32, %v22_v31 }
  0x8c   :  { %v70_v37 = vmax.f32 %v48_v33, 0.0 }
  0x8e   :  { %183 = vmatmul.f32.vlgmr.msra.gmra.mxu0 %v70_v37 }
  0x8f   :  { %77 = vrot.lane.b32.xlu0 %v71_v29, %s327_s11  ;;  %s329_s11 = smov [#allocation2]  }
  0x90   :  { %s278_s12 = sshll.u32 %s329_s11, 4  ;;  %s279_s12 = int_to_ptr.vmem [resolvable:$true] %s278_s12 }
  0xf9   :  { %v74_v42 = vpop.permute.xlu0 %73 }
  0xfa   :  { %v76_v43 = vadd.f32 %v74_v42, %v70_v37 }
 0x101   :  { %v78_v44 = vpop.permute.xlu0 %77 }
 0x102   :  { %v80_v45 = vadd.f32 %v78_v44, %v76_v43 }
 0x104   :  { %87 = vrot.lane.b32.xlu1 %v80_v45, %s328_s25  ;;  %v204_v4 = vpop.f32.mrf.mxu1 }
 0x10b   :  { %v184_v1 = vpop.f32.mrf.mxu0 }
 0x176   :  { %v88_v48 = vpop.permute.xlu1 %87 }
 0x177   :  { %291 = vmatmul.msk.f32.vlgmr.msra.gmra.mxu2 %vm89_vm2, %v88_v48 }
 0x1fa   :  { %v109_v55 = vpop.f32.mrf.mxu2 }
 0x1fb   :  { %v110_v56 = vadd.f32 %v109_v55, %v85_v54 }
 0x1fd   :  { %v112_v57 = vmax.f32 %v110_v56, 0.0 }
 0x1ff   :  { %292 = vmatmul.msk.f32.vlgmr.msrb.gmra.mxu3 %vm89_vm2, %v112_v57 }
 0x282   :  { %v161_v2 = vpop.f32.mrf.mxu3 }
 0x283   :  { %v185_v3 = vadd.f32 %v184_v1, %v161_v2 }
 0x285   :  { %v205_v6 = vadd.f32 %v204_v4, %v185_v3 }
 0x287   :  { %v208_v7 = vadd.f32 %v207_v5, %v205_v6 }
 0x289   :  { %v209_v8 = vmax.f32 %v208_v7, 0.0 }
 0x28b   :  { %294 = vmatmul.msk.f32.vlgmr.msrb.gmra.mxu2 %vm164_vm1, %v209_v8 }
 0x30e   :  { %v239_v12 = vpop.f32.mrf.mxu2 }
 0x30f   :  { %v240_v13 = vadd.f32 %v239_v12, %v218_v11 }
 0x311   :  { %v242_v14 = vmax.f32 %v240_v13, 0.0 }
 0x313   :  { %295 = vmatmul.msk.f32.vlgmr.msra.gmra.mxu3 %vm89_vm2, %v242_v14 }
 0x396   :  { %v268_v16 = vpop.f32.mrf.mxu3 }
 0x397   :  { %v269_v17 = vadd.f32 %v268_v16, %v247_v15 }
 0x399   :  { %272 = vst.msk [vmem:[#allocation2] sm:$0xff] %vm271_vm3, %v269_v17 }
 0x39a   :  { %283 = dma.vmem_to_hbm [thread:$0]  %s279_s12, 128, %s281_s1, [#allocation3]  }
 0x39b   :  { %324 = dma.done.wait [#allocation3], 128  }
 0x39c   :  { %325 = vsyncadd [#allocation3], 4294967168 }
 0x39d   :  { %288 = vsyncpa [#allocation3], 1 }

</bundles_post_ra>
